<compile_context>
chip_gen: v6e
topology: v6e:2x2x1
jax: 0.10.0
libtpu: 0.0.40
codegen_flags: <defaults>
</compile_context>

<pallas_src>
import math

import jax
import jax.numpy as jnp
from jax.experimental import pallas as pl
from jax.experimental.pallas import tpu as pltpu


def _round_up(x, m):
    return (x + m - 1) // m * m


# ----------------------------------------------------------------------------
# Kernels
# ----------------------------------------------------------------------------
def _td_matmul_kernel(d_ref, wt_ref, b_ref, o_ref):
    # d_ref : (TM, In)    VMEM batch tile (boundary tile rows may be padding)
    # wt_ref: (In, Out)   VMEM (W.T, resident across all grid steps)
    # b_ref : (1, Out)    VMEM
    # o_ref : (TM, Out)   VMEM
    z = jnp.dot(d_ref[...], wt_ref[...], preferred_element_type=jnp.float32)
    z = z + b_ref[...]                        # broadcast bias over batch rows
    o_ref[...] = jnp.exp(-jnp.maximum(z, 0.0)).astype(o_ref.dtype)


def _td_diag_kernel(d_ref, w_ref, b_ref, o_ref):
    # Elementwise path: gamma = exp(-relu(d * diag(W) + b)).  VPU + EUP only.
    # d_ref : (TM, In)   VMEM
    # w_ref : (1, In)    VMEM  (diag(W), resident)
    # b_ref : (1, In)    VMEM
    # o_ref : (TM, In)   VMEM
    z = d_ref[...].astype(jnp.float32) * w_ref[...] + b_ref[...]
    o_ref[...] = jnp.exp(-jnp.maximum(z, 0.0)).astype(o_ref.dtype)


# ----------------------------------------------------------------------------
# Parameter prep (done ONCE, hoisted out of the per-call forward path)
# ----------------------------------------------------------------------------
def prepare_temporal_decay_params(W, b, diag=False):
    """W: (output_size, input_size), b: (output_size,) -> kernel-layout params."""
    output_size, input_size = W.shape
    if diag:
        assert input_size == output_size
        w_k = jnp.diagonal(W).reshape(1, input_size)      # (1, In)
    else:
        w_k = W.T                                          # (In, Out)
    b_k = b.reshape(1, output_size)                        # (1, Out)
    return jnp.asarray(w_k), jnp.asarray(b_k)


# ----------------------------------------------------------------------------
# Forward
# ----------------------------------------------------------------------------
def _temporal_decay_forward(d, w_k, b_k, *, diag):
    batch, input_size = d.shape
    output_size = b_k.shape[-1]

    # Batch tile: multiple of 8 (f32 sublane), capped so even huge batches
    # double-buffer comfortably inside scoped VMEM.  Boundary block (if the
    # tile does not divide `batch`) is handled by Pallas write masking.
    tm = min(_round_up(max(batch, 1), 8), 512)
    grid = (pl.cdiv(batch, tm),)

    if diag:
        kernel = _td_diag_kernel
        in_specs = [
            pl.BlockSpec((tm, input_size), lambda i: (i, 0)),
            pl.BlockSpec((1, input_size), lambda i: (0, 0)),
            pl.BlockSpec((1, input_size), lambda i: (0, 0)),
        ]
        cost = pl.CostEstimate(
            flops=3 * batch * output_size,
            transcendentals=batch * output_size,
            bytes_accessed=4 * (batch * input_size + 2 * input_size
                                + batch * output_size),
        )
    else:
        kernel = _td_matmul_kernel
        in_specs = [
            pl.BlockSpec((tm, input_size), lambda i: (i, 0)),
            pl.BlockSpec((input_size, output_size), lambda i: (0, 0)),
            pl.BlockSpec((1, output_size), lambda i: (0, 0)),
        ]
        cost = pl.CostEstimate(
            flops=2 * batch * input_size * output_size + 2 * batch * output_size,
            transcendentals=batch * output_size,
            bytes_accessed=4 * (batch * input_size + input_size * output_size
                                + output_size + batch * output_size),
        )

    return pl.pallas_call(
        kernel,
        out_shape=jax.ShapeDtypeStruct((batch, output_size), d.dtype),
        grid_spec=pltpu.PrefetchScalarGridSpec(
            num_scalar_prefetch=0,
            grid=grid,
            in_specs=in_specs,
            out_specs=pl.BlockSpec((tm, output_size), lambda i: (i, 0)),
        ),
        compiler_params=pltpu.CompilerParams(
            # batch grid axis is independent -> shardable across v7x's 2 TCs
            dimension_semantics=("parallel",),
        ),
        cost_estimate=cost,
    )(d, w_k, b_k)


def make_temporal_decay(W, b, diag=False):
    """Returns a jitted forward fn d -> gamma with params prepared once."""
    w_k, b_k = prepare_temporal_decay_params(W, b, diag)

    @jax.jit
    def fwd(d):
        return _temporal_decay_forward(d, w_k, b_k, diag=diag)

    return fwd


def temporal_decay(d, W, b, diag=False):
    """Convenience one-shot call (prep + forward)."""
    w_k, b_k = prepare_temporal_decay_params(W, b, diag)
    return _temporal_decay_forward(d, w_k, b_k, diag=diag)


# ----------------------------------------------------------------------------
# Self-test
# ----------------------------------------------------------------------------
if __name__ == "__main__":
    key = jax.random.PRNGKey(0)
    k_d, k_w, k_b, k_w2, k_b2 = jax.random.split(key, 5)

    batch = 8
    input_size = 32
    output_size = 32          # equal so the diag=True branch is also exercised

    # Deterministic parameter init matching reset_parameters():
    # uniform(-stdv, stdv) with stdv = 1/sqrt(output_size)
    stdv = 1.0 / math.sqrt(output_size)
    W = jax.random.uniform(k_w, (output_size, input_size),
                           minval=-stdv, maxval=stdv, dtype=jnp.float32)
    b = jax.random.uniform(k_b, (output_size,),
                           minval=-stdv, maxval=stdv, dtype=jnp.float32)

    # Example input: time-deltas are non-negative in BRITS
    d = jax.random.uniform(k_d, (batch, input_size),
                           minval=0.0, maxval=5.0, dtype=jnp.float32)

    # diag=False path (MXU matmul kernel)
    td = make_temporal_decay(W, b, diag=False)
    gamma = jax.block_until_ready(td(d))
    ref = jnp.exp(-jnp.maximum(d @ W.T + b, 0.0))
    assert gamma.shape == (batch, output_size)
    assert jnp.allclose(gamma, ref, atol=1e-5, rtol=1e-5), "diag=False mismatch"

    # diag=True path (pure VPU/EUP elementwise kernel on diag(W))
    td_diag = make_temporal_decay(W, b, diag=True)
    gamma_diag = jax.block_until_ready(td_diag(d))
    ref_diag = jnp.exp(-jnp.maximum(d @ (W * jnp.eye(input_size)).T + b, 0.0))
    assert gamma_diag.shape == (batch, output_size)
    assert jnp.allclose(gamma_diag, ref_diag, atol=1e-5, rtol=1e-5), \
        "diag=True mismatch"

    # Rectangular (output_size != input_size) diag=False case.
    out2 = 48
    stdv2 = 1.0 / math.sqrt(out2)
    W2 = jax.random.uniform(k_w2, (out2, input_size),
                            minval=-stdv2, maxval=stdv2, dtype=jnp.float32)
    b2 = jax.random.uniform(k_b2, (out2,),
                            minval=-stdv2, maxval=stdv2, dtype=jnp.float32)
    gamma2 = jax.block_until_ready(temporal_decay(d, W2, b2, diag=False))
    ref2 = jnp.exp(-jnp.maximum(d @ W2.T + b2, 0.0))
    assert gamma2.shape == (batch, out2)
    assert jnp.allclose(gamma2, ref2, atol=1e-5, rtol=1e-5), "rect mismatch"

    # Non-multiple-of-8 batch exercises the masked boundary block.
    d_big = jax.random.uniform(jax.random.PRNGKey(1), (300, input_size),
                               minval=0.0, maxval=5.0, dtype=jnp.float32)
    gamma_big = jax.block_until_ready(temporal_decay(d_big, W, b, diag=False))
    ref_big = jnp.exp(-jnp.maximum(d_big @ W.T + b, 0.0))
    assert jnp.allclose(gamma_big, ref_big, atol=1e-5, rtol=1e-5), \
        "masked-boundary-batch mismatch"

    print("KERNEL_OK")
</pallas_src>

<mosaic_0001>
module attributes {stable_mosaic.version = 11 : i64} {
  func.func @_td_matmul_kernel(%arg0: i32, %arg1: memref<8x32xf32, #tpu.memory_space<vmem>>, %arg2: memref<32x32xf32, #tpu.memory_space<vmem>>, %arg3: memref<1x32xf32, #tpu.memory_space<vmem>>, %arg4: memref<8x32xf32, #tpu.memory_space<vmem>>) attributes {dimension_semantics = [#tpu.dimension_semantics<parallel>], iteration_bounds = array<i64: 1>, scalar_prefetch = 0 : i64, scratch_operands = 0 : i64, tpu.core_type = #tpu.core_type<tc>, window_params = [{transform_indices = @transform_0, window_bounds = array<i64: 8, 32>}, {pipeline_mode = #tpu.pipeline_mode<synchronous>, transform_indices = @transform_1, window_bounds = array<i64: 32, 32>}, {pipeline_mode = #tpu.pipeline_mode<synchronous>, transform_indices = @transform_2, window_bounds = array<i64: 1, 32>}, {transform_indices = @transform_3, window_bounds = array<i64: 8, 32>}]} {
    %c0 = arith.constant 0 : index
    %c0_0 = arith.constant 0 : index
    %0 = vector.load %arg1[%c0, %c0_0] : memref<8x32xf32, #tpu.memory_space<vmem>>, vector<8x32xf32>
    %c0_1 = arith.constant 0 : index
    %c0_2 = arith.constant 0 : index
    %1 = vector.load %arg2[%c0_1, %c0_2] : memref<32x32xf32, #tpu.memory_space<vmem>>, vector<32x32xf32>
    %cst = arith.constant dense<0.000000e+00> : vector<8x32xf32>
    %2 = tpu.matmul %0, %1, %cst {dimension_numbers = #tpu.dot_dimension_numbers<[1], [0], [0], [1], [0, 0, 1, 1], [], []>} : vector<8x32xf32>, vector<32x32xf32>, vector<8x32xf32> -> vector<8x32xf32>
    %c0_3 = arith.constant 0 : index
    %c0_4 = arith.constant 0 : index
    %3 = vector.load %arg3[%c0_3, %c0_4] : memref<1x32xf32, #tpu.memory_space<vmem>>, vector<1x32xf32>
    %4 = vector.broadcast %3 : vector<1x32xf32> to vector<8x32xf32>
    %5 = arith.addf %2, %4 : vector<8x32xf32>
    %cst_5 = arith.constant 0.000000e+00 : f32
    %6 = vector.broadcast %cst_5 : f32 to vector<8x32xf32>
    %7 = arith.maximumf %5, %6 : vector<8x32xf32>
    %cst_6 = arith.constant 0.000000e+00 : f32
    %8 = vector.broadcast %cst_6 : f32 to vector<8x32xf32>
    %9 = arith.subf %8, %7 : vector<8x32xf32>
    %10 = math.exp %9 : vector<8x32xf32>
    %c0_7 = arith.constant 0 : index
    %c0_8 = arith.constant 0 : index
    %11 = vector.load %arg4[%c0_7, %c0_8] : memref<8x32xf32, #tpu.memory_space<vmem>>, vector<8x32xf32>
    tpu.vector_store %arg4[%c0_7, %c0_8], %10 {strides = array<i32>} : memref<8x32xf32, #tpu.memory_space<vmem>>, vector<8x32xf32>,
    return
  }
  func.func @transform_0(%arg0: i32) -> (i32, i32) {
    %c0_i32 = arith.constant 0 : i32
    %c0_i32_0 = arith.constant 0 : i32
    return %arg0, %c0_i32 : i32, i32
  }
  func.func @transform_1(%arg0: i32) -> (i32, i32) {
    %c0_i32 = arith.constant 0 : i32
    %c0_i32_0 = arith.constant 0 : i32
    %c0_i32_1 = arith.constant 0 : i32
    return %c0_i32, %c0_i32_0 : i32, i32
  }
  func.func @transform_2(%arg0: i32) -> (i32, i32) {
    %c0_i32 = arith.constant 0 : i32
    %c0_i32_0 = arith.constant 0 : i32
    %c0_i32_1 = arith.constant 0 : i32
    return %c0_i32, %c0_i32_0 : i32, i32
  }
  func.func @transform_3(%arg0: i32) -> (i32, i32) {
    %c0_i32 = arith.constant 0 : i32
    %c0_i32_0 = arith.constant 0 : i32
    return %arg0, %c0_i32 : i32, i32
  }
}

</mosaic_0001>

<bundles_post_ra>
// kernel: fwd.1
= control target key start
LH: loop header
LB: loop body
LE: loop exit
PB: predicated region body
PF: predicated region fallthrough
CT: control target
= control target key end

     0   :  { %8 = vsyncpa [#allocation3], 0  ;;  %s282_s0 = inlined_call_operand.hbm [shape: f32[8,32], index: 0, kind: input, shape index: {}]   ;;  %s283_s1 = inlined_call_operand.hbm [shape: f32[32,32], index: 1, kind: input, shape index: {}]   ;;  %s284_s2 = inlined_call_operand.vmem [shape: f32[1,32], index: 2, kind: input, shape index: {}]   ;;  %s285_s3 = inlined_call_operand.hbm [shape: f32[8,32], index: 3, kind: output, shape index: {}]  }
   0x1   :  { %9 = vsyncpa [#allocation6], 0 }
   0x2   :  { %10 = vsyncpa [#allocation4], 0  ;;  %s241_s12 = smov [#allocation2]   ;;  %s242_s14 = smov [#allocation5]  }
   0x3   :  { %s17_s13 = sshll.u32 %s241_s12, 4  ;;  %s26_s15 = sshll.u32 %s242_s14, 4  ;;  %s18_s13 = int_to_ptr.vmem [resolvable:$true] %s17_s13  ;;  %s27_s15 = int_to_ptr.vmem [resolvable:$true] %s26_s15 }
   0x4   :  { %s183_s16 = scalar_lea.vmem %s18_s13, 128  ;;  %p188_p1 = scmp.lt.s32.totalorder %s18_s13, %s18_s13 }
   0x5   :  { %p184_p0 = scmp.ne.s32.totalorder %s18_s13, %s183_s16  ;;  %p189_p2 = scmp.lt.s32.totalorder %s183_s16, %s183_s16 }
   0x7   :  { %p190_p3 = por %p189_p2, %p188_p1 }
   0x9   :  { %p191_p4 = pnand %p190_p3, %p184_p0 }
   0xb   :  { %194 = shalt.err (!%p191_p4)
}
   0xc   :  { %20 = dma.hbm_to_vmem [thread:$0]  %s282_s0, 128, %s18_s13, [#allocation3]  }
   0xd   :  { %s203_s19 = scalar_lea.vmem %s27_s15, 512  ;;  %p208_p6 = scmp.lt.s32.totalorder %s27_s15, %s27_s15 }
   0xe   :  { %p204_p5 = scmp.ne.s32.totalorder %s27_s15, %s203_s19  ;;  %p209_p7 = scmp.lt.s32.totalorder %s203_s19, %s203_s19 }
  0x10   :  { %p210_p8 = por %p209_p7, %p208_p6 }
  0x12   :  { %p211_p9 = pnand %p210_p8, %p204_p5 }
  0x14   :  { %214 = shalt.err (!%p211_p9)
}
  0x15   :  { %s243_s20 = smov 128   ;;  %s244_s21 = smov 8  }
  0x16   :  { %32 = dma.hbm_to_vmem [thread:$0]  %s283_s1, 512, %s27_s15, [#allocation6], %s243_s20, %s243_s20, %s244_s21  }
  0x17   :  { %235 = dma.done.wait [#allocation3], 128  }
  0x18   :  { %236 = vsyncadd [#allocation3], 4294967168 }
  0x19   :  { %237 = dma.done.wait [#allocation6], 512  }
  0x1a   :  { %238 = vsyncadd [#allocation6], 4294966784  ;;  %v245_v0 = vmov 0.0   ;;  %vm246_vm0 = vmmov 0   ;;  %v45_v1 = vld [vmem:[#allocation5 + $0x18] sm:$0xff]  ;;  %v44_v2 = vld [vmem:[#allocation5 + $0x10] sm:$0xff] }
  0x1b   :  { %155 = vmatprep.subr.mxu0 %v245_v0  ;;  %163 = vmatprep.mubr.msk.f32.mxu0 %vm246_vm0, %v245_v0  ;;  %v43_v3 = vld [vmem:[#allocation5 + $0x8] sm:$0xff]  ;;  %v42_v4 = vld [vmem:[#allocation5] sm:$0xff]  ;;  %v41_v5 = vld [vmem:[#allocation2] sm:$0xff]  ;;  %vm53_vm1 = vcmask 261120   ;;  %s247_s24 = smov [#allocation7]  }
  0x1c   :  { %156 = vmatpush3.msra.mxu0 %v45_v1  ;;  %v148_v6 = vld [vmem:[%s284_s2] ss:$0 sm:$0xff]  ;;  %s138_s25 = sshll.u32 %s247_s24, 4  ;;  %s139_s25 = int_to_ptr.vmem [resolvable:$true] %s138_s25 }
  0x1d   :  { %157 = vmatprep.subr.mxu0 %v245_v0  ;;  %s215_s26 = scalar_lea.vmem %s139_s25, 128  ;;  %p220_p11 = scmp.lt.s32.totalorder %s139_s25, %s139_s25 }
  0x1e   :  { %158 = vmatpush3.msra.mxu0 %v44_v2  ;;  %p216_p10 = scmp.ne.s32.totalorder %s139_s25, %s215_s26  ;;  %p221_p12 = scmp.lt.s32.totalorder %s215_s26, %s215_s26 }
  0x1f   :  { %159 = vmatprep.subr.mxu0 %v245_v0 }
  0x20   :  { %160 = vmatpush3.msra.mxu0 %v43_v3  ;;  %p222_p13 = por %p221_p12, %p220_p11 }
  0x21   :  { %161 = vmatprep.subr.mxu0 %v245_v0 }
  0x22   :  { %162 = vmatpush3.msra.mxu0 %v42_v4  ;;  %p223_p0 = pnand %p222_p13, %p216_p10 }
  0x23   :  { %164 = vmatmul.mubr.msk.f32.vlgmr.msra.gmra.mxu0 %vm53_vm1, %v41_v5 }
  0xe3   :  { %v123_v7 = vpop.f32.mrf.mxu0 }
  0xe4   :  { %v124_v8 = vadd.f32 %v148_v6, %v123_v7 }
  0xe5   :  { %v165_v9 = vpop.f32.mrf.mxu0 }
  0xe6   :  { %v127_v10 = vmax.f32 %v124_v8, 0.0 }
  0xe8   :  { %v128_v11 = vsub.f32 0.0, %v127_v10 }
  0xea   :  { %v129_v12 = vmul.f32 1.442695, %v128_v11 }
  0xec   :  { %173 = vpow2.f32 %v129_v12 }
  0xf9   :  { %v174_v13 = vpop.eup %173 }
  0xfa   :  { %131 = vst.msk [vmem:[#allocation7] sm:$0xff] %vm53_vm1, %v174_v13 }
  0xfb   :  { %226 = shalt.err (!%p223_p0)
}
  0xfc   :  { %141 = dma.vmem_to_hbm [thread:$0]  %s139_s25, 128, %s285_s3, [#allocation4]  }
  0xfd   :  { %239 = dma.done.wait [#allocation4], 128  }
  0xfe   :  { %240 = vsyncadd [#allocation4], 4294967168 }
  0xff   :  { %145 = vsyncpa [#allocation3], 1 }
 0x100   :  { %146 = vsyncpa [#allocation6], 1 }
 0x101   :  { %147 = vsyncpa [#allocation4], 1 }

</bundles_post_ra>
